<compile_context>
chip_gen: v5e
topology: v5e:2x2
jax: 0.10.0
libtpu: 0.0.40
codegen_flags: <defaults>
</compile_context>

<pallas_src>
from functools import reduce
import operator

import jax
import jax.numpy as jnp
from jax.experimental import pallas as pl
from jax.experimental.pallas import tpu as pltpu


# ------------------------------ Pallas kernel --------------------------------
def _drop_path_kernel(x_ref, scale_ref, o_ref):
    # scale_ref is (TB, 1): per-sample keep/drop already divided by keep_prob.
    # Broadcast multiply over the lane-dense feature tile.
    o_ref[...] = x_ref[...] * scale_ref[...]


def _round_up(v: int, m: int) -> int:
    return (v + m - 1) // m * m


# -------------------------------- wrapper -------------------------------------
def drop_path(x, drop_prob: float = 0.0, *, training: bool = False, key=None):
    """Pallas TPU implementation of timm-style drop_path (stochastic depth)."""
    if drop_prob == 0.0 or not training:
        return x  # exact PyTorch short-circuit

    keep_prob = 1.0 - float(drop_prob)
    if key is None:
        key = jax.random.PRNGKey(0)

    batch = x.shape[0]
    feat = int(reduce(operator.mul, x.shape[1:], 1)) if x.ndim > 1 else 1
    x2 = x.reshape(batch, feat)

    # Per-sample mask, same math as torch: floor(keep_prob + U), U ~ [0, 1).
    # Fold the 1/keep_prob division in so the kernel is one multiply.
    # TODO(synk): torch.rand's RNG stream cannot be reproduced bit-for-bit;
    # this draws the same Bernoulli(keep_prob) distribution via jax.random.
    u = jax.random.uniform(key, (batch, 1), dtype=jnp.float32)
    scale = (jnp.floor(jnp.float32(keep_prob) + u) / jnp.float32(keep_prob)).astype(
        x2.dtype
    )

    # Sublane/lane-dense padding: rows % 8 == 0, cols % 128 == 0 (unmasked vld/vst).
    rows = _round_up(batch, 8)
    cols = _round_up(feat, 128)
    if (rows, cols) != (batch, feat):
        x2 = jnp.pad(x2, ((0, rows - batch), (0, cols - feat)))
        scale = jnp.pad(scale, ((0, rows - batch), (0, 0)))

    # Tile sizes: <= 256 x 2048 f32 = 2 MiB per tile. With in+out double
    # buffering that is ~8 MiB — well inside the scoped VMEM default on
    # v5e (16 MiB), v6e (32 MiB) and v7x (32 MiB default / 64 MiB physical).
    TB = min(rows, 256)   # rows is a multiple of 8, so TB is too
    TF = min(cols, 2048)  # cols is a multiple of 128, so TF is too
    grid = (pl.cdiv(rows, TB), pl.cdiv(cols, TF))

    itemsize = jnp.dtype(x2.dtype).itemsize
    cost = pl.CostEstimate(
        flops=rows * cols,
        transcendentals=0,
        bytes_accessed=(2 * rows * cols + rows) * itemsize,
    )

    out = pl.pallas_call(
        _drop_path_kernel,
        out_shape=jax.ShapeDtypeStruct((rows, cols), x2.dtype),
        grid=grid,
        in_specs=[
            pl.BlockSpec((TB, TF), lambda i, j: (i, j)),
            # Per-sample scale depends ONLY on the row-tile index -> every
            # feature tile of a sample sees the same Bernoulli draw.
            pl.BlockSpec((TB, 1), lambda i, j: (i, 0)),
        ],
        out_specs=pl.BlockSpec((TB, TF), lambda i, j: (i, j)),
        compiler_params=pltpu.CompilerParams(
            dimension_semantics=("parallel", "parallel"),
            vmem_limit_bytes=32 * 1024 * 1024,
        ),
        cost_estimate=cost,
    )(x2, scale)

    return out[:batch, :feat].reshape(x.shape)


class DropPath:
    """Stateless JAX mirror of the PyTorch DropPath nn.Module."""

    def __init__(self, drop_prob=None):
        self.drop_prob = 0.0 if drop_prob is None else float(drop_prob)
        self.training = True

    def __call__(self, x, *, key=None):
        return drop_path(x, self.drop_prob, training=self.training, key=key)


# ------------------------------ demo / check ----------------------------------
if __name__ == "__main__":
    key = jax.random.PRNGKey(0)
    k_x, k_mask = jax.random.split(key)

    # Small shapes consistent with the module's typical use inside a ViT block:
    # x = (batch, seq, hidden)
    B, N, D = 2, 8, 32
    x = jax.random.normal(k_x, (B, N, D), dtype=jnp.float32)
    drop_prob = 0.25
    keep_prob = 1.0 - drop_prob

    # Training mode: kernel runs; each sample is either zeroed or scaled by
    # 1/keep_prob (per-sample stochastic depth).
    y = jax.block_until_ready(drop_path(x, drop_prob, training=True, key=k_mask))
    assert y.shape == x.shape
    assert bool(jnp.all(jnp.isfinite(y)))
    for b in range(B):
        dropped = bool(jnp.allclose(y[b], 0.0, atol=1e-6))
        kept = bool(jnp.allclose(y[b], x[b] / keep_prob, atol=1e-5, rtol=1e-5))
        assert dropped or kept, f"sample {b}: output neither dropped nor kept/scaled"

    # Eval mode / p == 0: identity, matching the PyTorch short-circuit.
    y_eval = jax.block_until_ready(drop_path(x, drop_prob, training=False))
    assert bool(jnp.allclose(y_eval, x))
    y_p0 = jax.block_until_ready(drop_path(x, 0.0, training=True))
    assert bool(jnp.allclose(y_p0, x))

    # Module-style usage.
    m = DropPath(drop_prob)
    m.training = True
    y_mod = jax.block_until_ready(m(x, key=k_mask))
    assert bool(jnp.allclose(y_mod, y))

    print("KERNEL_OK")
</pallas_src>

<mosaic_0001>
module attributes {stable_mosaic.version = 11 : i64} {
  func.func @_drop_path_kernel(%arg0: i32, %arg1: i32, %arg2: memref<8x256xf32, #tpu.memory_space<vmem>>, %arg3: memref<8x1xf32, #tpu.memory_space<vmem>>, %arg4: memref<8x256xf32, #tpu.memory_space<vmem>>) attributes {dimension_semantics = [#tpu.dimension_semantics<parallel>, #tpu.dimension_semantics<parallel>], iteration_bounds = array<i64: 1, 1>, scalar_prefetch = 0 : i64, scratch_operands = 0 : i64, tpu.core_type = #tpu.core_type<tc>, window_params = [{transform_indices = @transform_0, window_bounds = array<i64: 8, 256>}, {transform_indices = @transform_1, window_bounds = array<i64: 8, 1>}, {transform_indices = @transform_2, window_bounds = array<i64: 8, 256>}]} {
    %c0 = arith.constant 0 : index
    %c0_0 = arith.constant 0 : index
    %0 = vector.load %arg2[%c0, %c0_0] : memref<8x256xf32, #tpu.memory_space<vmem>>, vector<8x256xf32>
    %c0_1 = arith.constant 0 : index
    %c0_2 = arith.constant 0 : index
    %1 = vector.load %arg3[%c0_1, %c0_2] : memref<8x1xf32, #tpu.memory_space<vmem>>, vector<8x1xf32>
    %2 = vector.broadcast %1 : vector<8x1xf32> to vector<8x256xf32>
    %3 = arith.mulf %0, %2 : vector<8x256xf32>
    %c0_3 = arith.constant 0 : index
    %c0_4 = arith.constant 0 : index
    %4 = vector.load %arg4[%c0_3, %c0_4] : memref<8x256xf32, #tpu.memory_space<vmem>>, vector<8x256xf32>
    tpu.vector_store %arg4[%c0_3, %c0_4], %3 {strides = array<i32>} : memref<8x256xf32, #tpu.memory_space<vmem>>, vector<8x256xf32>,
    return
  }
  func.func @transform_0(%arg0: i32, %arg1: i32) -> (i32, i32) {
    %c0_i32 = arith.constant 0 : i32
    return %arg0, %arg1 : i32, i32
  }
  func.func @transform_1(%arg0: i32, %arg1: i32) -> (i32, i32) {
    %c0_i32 = arith.constant 0 : i32
    %c0_i32_0 = arith.constant 0 : i32
    return %arg0, %c0_i32 : i32, i32
  }
  func.func @transform_2(%arg0: i32, %arg1: i32) -> (i32, i32) {
    %c0_i32 = arith.constant 0 : i32
    return %arg0, %arg1 : i32, i32
  }
}

</mosaic_0001>

<bundles_post_ra>
// kernel: tpu_custom_call.1
= control target key start
LH: loop header
LB: loop body
LE: loop exit
PB: predicated region body
PF: predicated region fallthrough
CT: control target
= control target key end

     0   :  { %7 = vsyncpa [#allocation3], 0  ;;  %s138_s0 = inlined_call_operand.hbm [shape: f32[8,256], index: 0, kind: input, shape index: {}]   ;;  %s139_s1 = inlined_call_operand.vmem [shape: f32[8,1], index: 1, kind: input, shape index: {}]   ;;  %s140_s2 = inlined_call_operand.hbm [shape: f32[8,256], index: 2, kind: output, shape index: {}]  }
   0x1   :  { %8 = vsyncpa [#allocation4], 0  ;;  %s14_s11 = sshll.u32 %s138_s0, 4  ;;  %s111_s12 = smov [#allocation2]   ;;  %s15_s11 = int_to_ptr.hbm [resolvable:$true] %s14_s11 }
   0x2   :  { %s16_s13 = sshll.u32 %s111_s12, 4  ;;  %s17_s13 = int_to_ptr.vmem [resolvable:$true] %s16_s13 }
   0x3   :  { %19 = dma.hbm_to_vmem [thread:$0]  %s15_s11, 256, %s17_s13, [#allocation3]  }
   0x4   :  { %107 = dma.done.wait [#allocation3], 256  }
   0x5   :  { %108 = vsyncadd [#allocation3], 4294967040  ;;  %v112_v0 = vmov 0   ;;  %v28_v1 = vld [vmem:[%s139_s1] sm:$0xff]  ;;  %v27_v3 = vld [vmem:[#allocation2 + $0x8] sm:$0xff]  ;;  %s113_s16 = smov [#allocation5]  }
   0x6   :  { %58 = vset.pattern.permute.xlu0 %v112_v0  ;;  %v26_v2 = vld [vmem:[#allocation2] sm:$0xff]  ;;  %s43_s17 = sshll.u32 %s113_s16, 4  ;;  %s45_s19 = sshll.u32 %s140_s2, 4  ;;  %s44_s17 = int_to_ptr.vmem [resolvable:$true] %s43_s17  ;;  %s46_s19 = int_to_ptr.hbm [resolvable:$true] %s45_s19 }
   0x7   :  { %31 = vperm.xlu0 %58, %v28_v1  }
  0x79   :  { %v32_v4 = vpop.permute.xlu0 %31 }
  0x7a   :  { %v34_v5 = vmul.f32 %v32_v4, %v26_v2  ;;  %v35_v6 = vmul.f32 %v32_v4, %v27_v3 }
  0x7c   :  { %36 = vst [vmem:[#allocation5] sm:$0xff] %v34_v5 }
  0x7d   :  { %37 = vst [vmem:[#allocation5 + $0x8] sm:$0xff] %v35_v6 }
  0x7e   :  { %48 = dma.vmem_to_hbm [thread:$0]  %s44_s17, 256, %s46_s19, [#allocation4]  }
  0x7f   :  { %109 = dma.done.wait [#allocation4], 256  }
  0x80   :  { %110 = vsyncadd [#allocation4], 4294967040 }
  0x81   :  { %53 = vsyncpa [#allocation3], 1 }
  0x82   :  { %54 = vsyncpa [#allocation4], 1 }

</bundles_post_ra>
